<compile_context>
chip_gen: v7x
topology: tpu7x:2x2x1
jax: 0.10.0
libtpu: 0.0.40
codegen_flags: <defaults>
</compile_context>

<pallas_src>
import functools

import jax
import jax.numpy as jnp
import numpy as np
from jax.experimental import pallas as pl
from jax.experimental.pallas import tpu as pltpu


def _round_up(x, m):
    return ((x + m - 1) // m) * m


_TK_SINGLE = 2048                  # collapse the F-reduction grid when Fp <= this
_TK_CHOICES = (2048, 1024, 512)    # streaming K-tile sizes (largest dividing Fp)
_F_ALIGN_STREAM = 512              # F padding granularity in the streaming regime


@functools.lru_cache(maxsize=1)
def _has_two_tensorcores():
    # Best-effort chip detection: v7x-class parts have 2 TensorCores per chip.
    try:
        kind = jax.devices()[0].device_kind.lower()
    except Exception:
        return False
    return ("v7" in kind) or ("7x" in kind)


def _vmem_limit(footprint_bytes):
    # Scoped VMEM sized from the actual tile footprint (2x headroom), capped at
    # 32 MiB so it leaves room on 64-MiB-VMEM parts and never over-reserves.
    return int(min(32 * 1024 * 1024, max(4 * 1024 * 1024, 2 * footprint_bytes)))


def _heads_softmax_slab(enc_f32, w_h_ref, b_h_ref, action_size):
    """Fused heads + masked softmax.

    Returns the lane-dense (tm, Hp) slab [policy(0..A-1) | ve(lane A) | zeros].
    bf16 operands with f32 accumulation keep the MXU at full rate.
    """
    head = jnp.dot(enc_f32.astype(jnp.bfloat16), w_h_ref[...],
                   preferred_element_type=jnp.float32) + b_h_ref[...]
    lane = jax.lax.broadcasted_iota(jnp.int32, head.shape, 1)
    is_logit = lane < action_size
    logits = jnp.where(is_logit, head, jnp.float32(-1e30))
    m = jnp.max(logits, axis=-1, keepdims=True)
    e = jnp.where(is_logit, jnp.exp(logits - m), 0.0)
    denom = jnp.sum(e, axis=-1, keepdims=True)
    policy = e / denom  # exact normalization; once per batch tile, cost negligible
    return jnp.where(is_logit, policy, head)


def _rnd_single_kernel(x_ref, w_enc_ref, b_enc_ref, w_h_ref, b_h_ref, out_ref,
                       *, action_size):
    # Collapsed reduction: one MXU pass, no accumulator scratch / zero-init.
    enc = jnp.dot(x_ref[...], w_enc_ref[...], preferred_element_type=jnp.float32)
    enc = jnp.maximum(enc + b_enc_ref[...], 0.0)
    out_ref[...] = _heads_softmax_slab(enc, w_h_ref, b_h_ref, action_size)


def _rnd_stream_kernel(x_ref, w_enc_ref, b_enc_ref, w_h_ref, b_h_ref, out_ref,
                       acc_ref, *, action_size):
    # Grid: (batch tiles, F-reduction tiles); reduction axis last ("arbitrary").
    k = pl.program_id(1)

    @pl.when(k == 0)
    def _init():
        acc_ref[...] = jnp.zeros_like(acc_ref)

    acc_ref[...] += jnp.dot(x_ref[...], w_enc_ref[...],
                            preferred_element_type=jnp.float32)

    @pl.when(k == pl.num_programs(1) - 1)
    def _finalize():
        enc = jnp.maximum(acc_ref[...] + b_enc_ref[...], 0.0)
        out_ref[...] = _heads_softmax_slab(enc, w_h_ref, b_h_ref, action_size)


def prepare_params(params):
    """One-time weight preprocessing (hoisted out of the forward path).

    Pads/casts the weights into kernel-ready buffers so each forward call only
    streams the activations plus the already-bf16, already-padded weights.
    """
    w_enc, b_enc, w_pi, b_pi, w_ve, b_ve = params
    F, dense = int(w_enc.shape[0]), int(w_enc.shape[1])
    A = int(w_pi.shape[1])
    Hp = _round_up(A + 1, 128)

    Fp128 = _round_up(F, 128)
    Fp = Fp128 if Fp128 <= _TK_SINGLE else _round_up(F, _F_ALIGN_STREAM)

    # Encoder weight streamed as bf16, NOT lane-padded along `dense`
    # (block last dim == full array dim is legal); pad only along F.
    w_enc_p = w_enc.astype(jnp.bfloat16)
    if Fp > F:
        w_enc_p = jnp.pad(w_enc_p, ((0, Fp - F), (0, 0)))
    b_enc_p = b_enc.astype(jnp.float32).reshape(1, dense)

    # Fused heads [policy | Ve] packed into one lane-padded bf16 weight so the
    # head stage is one MXU matmul and the output slab is lane-dense.
    w_heads = jnp.zeros((dense, Hp), jnp.bfloat16)
    w_heads = w_heads.at[:, :A].set(w_pi.astype(jnp.bfloat16))
    w_heads = w_heads.at[:, A:A + 1].set(w_ve.astype(jnp.bfloat16))
    b_heads = jnp.zeros((1, Hp), jnp.float32)
    b_heads = b_heads.at[:, :A].set(b_pi.astype(jnp.float32).reshape(1, A))
    b_heads = b_heads.at[:, A:A + 1].set(b_ve.astype(jnp.float32).reshape(1, 1))

    buffers = dict(w_enc=w_enc_p, b_enc=b_enc_p, w_heads=w_heads, b_heads=b_heads)
    meta = dict(F=F, Fp=Fp, dense=dense, A=A, Hp=Hp)
    return buffers, meta


def rnd_forward(state, prepared):
    """Pallas implementation of RND.forward == PPOIntrinsic.forward.

    state: (B, C, H, W) float32 (NCHW, matching PyTorch)
    returns: (policy (B, A), value_extr (B,), value_intr (B,))
    """
    buffers, meta = prepared
    F, Fp, dense, A, Hp = (meta[k] for k in ("F", "Fp", "dense", "A", "Hp"))
    B = int(state.shape[0])
    assert int(np.prod(state.shape[1:])) == F

    # Single cast straight to bf16 (no intermediate f32 copy); pad only if the
    # batch / feature extents are not already tile-aligned.
    x = state.reshape(B, F).astype(jnp.bfloat16)

    single_shot = Fp <= _TK_SINGLE

    # Batch tile: 16-aligned (bf16 sublane packing). Larger cap in the
    # streaming regime so each pass over w_enc covers more batch rows.
    tm = min(128 if single_shot else 256, _round_up(max(B, 1), 16))
    if _has_two_tensorcores() and ((B + tm - 1) // tm == 1) and tm % 32 == 0:
        tm //= 2  # give the "parallel" batch axis extent >= 2 on 2-TC chips
    Bp = _round_up(B, tm)

    if Bp > B or Fp > F:
        x = jnp.pad(x, ((0, Bp - B), (0, Fp - F)))

    out_shape = jax.ShapeDtypeStruct((Bp, Hp), jnp.float32)
    resident_bytes = 2 * (dense * 4 + dense * Hp * 2 + Hp * 4)

    if single_shot:
        grid = (Bp // tm,)
        footprint = 2 * (tm * Fp * 2 + Fp * dense * 2 + tm * Hp * 4) + resident_bytes
        out = pl.pallas_call(
            functools.partial(_rnd_single_kernel, action_size=A),
            out_shape=out_shape,
            grid_spec=pltpu.PrefetchScalarGridSpec(
                num_scalar_prefetch=0,
                grid=grid,
                in_specs=[
                    pl.BlockSpec((tm, Fp), lambda i: (i, 0)),      # x batch tile
                    pl.BlockSpec((Fp, dense), lambda i: (0, 0)),   # w_enc (resident)
                    pl.BlockSpec((1, dense), lambda i: (0, 0)),    # b_enc (resident)
                    pl.BlockSpec((dense, Hp), lambda i: (0, 0)),   # fused heads
                    pl.BlockSpec((1, Hp), lambda i: (0, 0)),       # head bias
                ],
                out_specs=pl.BlockSpec((tm, Hp), lambda i: (i, 0)),
            ),
            compiler_params=pltpu.CompilerParams(
                dimension_semantics=("parallel",),
                vmem_limit_bytes=_vmem_limit(footprint),
            ),
        )(x, buffers["w_enc"], buffers["b_enc"],
          buffers["w_heads"], buffers["b_heads"])
    else:
        tk = next(t for t in _TK_CHOICES if Fp % t == 0)
        grid = (Bp // tm, Fp // tk)
        footprint = (2 * (tm * tk * 2 + tk * dense * 2 + tm * Hp * 4)
                     + tm * dense * 4 + resident_bytes)
        # NOTE: with batch tiles outer / reduction inner, w_enc K-tiles are
        # re-streamed once per batch tile; for training-sized batches where
        # F*dense*2 bytes fits VMEM, make w_enc resident instead.
        out = pl.pallas_call(
            functools.partial(_rnd_stream_kernel, action_size=A),
            out_shape=out_shape,
            grid_spec=pltpu.PrefetchScalarGridSpec(
                num_scalar_prefetch=0,
                grid=grid,
                in_specs=[
                    pl.BlockSpec((tm, tk), lambda i, k: (i, k)),     # x tile
                    pl.BlockSpec((tk, dense), lambda i, k: (k, 0)),  # w_enc K-tile
                    pl.BlockSpec((1, dense), lambda i, k: (0, 0)),   # b_enc
                    pl.BlockSpec((dense, Hp), lambda i, k: (0, 0)),  # fused heads
                    pl.BlockSpec((1, Hp), lambda i, k: (0, 0)),      # head bias
                ],
                out_specs=pl.BlockSpec((tm, Hp), lambda i, k: (i, 0)),
                scratch_shapes=[pltpu.VMEM((tm, dense), jnp.float32)],
            ),
            compiler_params=pltpu.CompilerParams(
                dimension_semantics=("parallel", "arbitrary"),
                vmem_limit_bytes=_vmem_limit(footprint),
            ),
        )(x, buffers["w_enc"], buffers["b_enc"],
          buffers["w_heads"], buffers["b_heads"])

    policy = out[:B, :A]
    ve = out[:B, A]
    value_extr = ve
    # Original PyTorch code computes value_intr with Ve as well (reused head).
    value_intr = ve
    return policy, value_extr, value_intr


def init_params(key, in_features, dense_size, action_size):
    """Deterministic synthetic init (PyTorch Linear shapes, stored as (in, out))."""
    k = jax.random.split(key, 6)
    scale_enc = 1.0 / np.sqrt(in_features)
    scale_head = 1.0 / np.sqrt(dense_size)
    w_enc = jax.random.uniform(k[0], (in_features, dense_size), jnp.float32,
                               -scale_enc, scale_enc)
    b_enc = jax.random.uniform(k[1], (1, dense_size), jnp.float32,
                               -scale_enc, scale_enc)
    w_pi = jax.random.uniform(k[2], (dense_size, action_size), jnp.float32,
                              -scale_head, scale_head)
    b_pi = jax.random.uniform(k[3], (1, action_size), jnp.float32,
                              -scale_head, scale_head)
    w_ve = jax.random.uniform(k[4], (dense_size, 1), jnp.float32,
                              -scale_head, scale_head)
    b_ve = jax.random.uniform(k[5], (1, 1), jnp.float32,
                              -scale_head, scale_head)
    return (w_enc, b_enc, w_pi, b_pi, w_ve, b_ve)


def _reference(state, params):
    """Pure-JAX f32 reference for correctness checking."""
    w_enc, b_enc, w_pi, b_pi, w_ve, b_ve = params
    x = state.reshape(state.shape[0], -1)
    enc = jnp.maximum(x @ w_enc + b_enc, 0.0)
    policy = jax.nn.softmax(enc @ w_pi + b_pi, axis=-1)
    ve = (enc @ w_ve + b_ve).reshape(-1)
    return policy, ve, ve


if __name__ == "__main__":
    action_size = 6
    dense_size = 32

    def run_case(case_key, B, C, H, W):
        in_features = C * H * W
        k_state, k_params = jax.random.split(case_key)
        state = jax.random.normal(k_state, (B, C, H, W), dtype=jnp.float32)
        params = init_params(k_params, in_features, dense_size, action_size)
        prepared = prepare_params(params)

        policy, v_extr, v_intr = rnd_forward(state, prepared)
        jax.block_until_ready((policy, v_extr, v_intr))

        # Sanity check against the pure-JAX f32 reference. Tolerance is loosened
        # vs f32 because x / w_enc / heads stream as bf16 (f32 accumulation).
        ref_policy, ref_ve, ref_vi = _reference(state, params)
        assert policy.shape == (B, action_size)
        assert v_extr.shape == (B,) and v_intr.shape == (B,)
        np.testing.assert_allclose(np.asarray(policy), np.asarray(ref_policy),
                                   rtol=2e-2, atol=2e-2)
        np.testing.assert_allclose(np.asarray(v_extr), np.asarray(ref_ve),
                                   rtol=2e-2, atol=2e-2)
        np.testing.assert_allclose(np.asarray(v_intr), np.asarray(ref_vi),
                                   rtol=2e-2, atol=2e-2)
        np.testing.assert_allclose(np.asarray(policy).sum(axis=-1),
                                   np.ones(B, np.float32), rtol=0, atol=1e-3)

    key = jax.random.PRNGKey(0)
    k1, k2 = jax.random.split(key)
    # Small NCHW state (F=1024): exercises the collapsed single-shot kernel.
    run_case(k1, B=2, C=4, H=16, W=16)
    # Larger flattened feature dim (F=4096): exercises the streaming kernel
    # (reduction grid + f32 VMEM accumulator).
    run_case(k2, B=2, C=4, H=32, W=32)

    print("KERNEL_OK")
</pallas_src>

<mosaic_0001>
module attributes {stable_mosaic.version = 11 : i64} {
  func.func @_rnd_single_kernel(%arg0: i32, %arg1: memref<16x1024xbf16, #tpu.memory_space<vmem>>, %arg2: memref<1024x32xbf16, #tpu.memory_space<vmem>>, %arg3: memref<1x32xf32, #tpu.memory_space<vmem>>, %arg4: memref<32x128xbf16, #tpu.memory_space<vmem>>, %arg5: memref<1x128xf32, #tpu.memory_space<vmem>>, %arg6: memref<16x128xf32, #tpu.memory_space<vmem>>) attributes {dimension_semantics = [#tpu.dimension_semantics<parallel>], iteration_bounds = array<i64: 1>, scalar_prefetch = 0 : i64, scratch_operands = 0 : i64, tpu.core_type = #tpu.core_type<tc>, window_params = [{transform_indices = @transform_0, window_bounds = array<i64: 16, 1024>}, {pipeline_mode = #tpu.pipeline_mode<synchronous>, transform_indices = @transform_1, window_bounds = array<i64: 1024, 32>}, {pipeline_mode = #tpu.pipeline_mode<synchronous>, transform_indices = @transform_2, window_bounds = array<i64: 1, 32>}, {pipeline_mode = #tpu.pipeline_mode<synchronous>, transform_indices = @transform_3, window_bounds = array<i64: 32, 128>}, {pipeline_mode = #tpu.pipeline_mode<synchronous>, transform_indices = @transform_4, window_bounds = array<i64: 1, 128>}, {transform_indices = @transform_5, window_bounds = array<i64: 16, 128>}]} {
    %c0 = arith.constant 0 : index
    %c0_0 = arith.constant 0 : index
    %0 = vector.load %arg1[%c0, %c0_0] : memref<16x1024xbf16, #tpu.memory_space<vmem>>, vector<16x1024xbf16>
    %c0_1 = arith.constant 0 : index
    %c0_2 = arith.constant 0 : index
    %1 = vector.load %arg2[%c0_1, %c0_2] : memref<1024x32xbf16, #tpu.memory_space<vmem>>, vector<1024x32xbf16>
    %cst = arith.constant dense<0.000000e+00> : vector<16x32xf32>
    %2 = tpu.matmul %0, %1, %cst {dimension_numbers = #tpu.dot_dimension_numbers<[1], [0], [0], [1], [0, 0, 1, 1], [], []>} : vector<16x1024xbf16>, vector<1024x32xbf16>, vector<16x32xf32> -> vector<16x32xf32>
    %c0_3 = arith.constant 0 : index
    %c0_4 = arith.constant 0 : index
    %3 = vector.load %arg3[%c0_3, %c0_4] : memref<1x32xf32, #tpu.memory_space<vmem>>, vector<1x32xf32>
    %4 = vector.broadcast %3 : vector<1x32xf32> to vector<16x32xf32>
    %5 = arith.addf %2, %4 : vector<16x32xf32>
    %cst_5 = arith.constant 0.000000e+00 : f32
    %6 = vector.broadcast %cst_5 : f32 to vector<16x32xf32>
    %7 = arith.maximumf %5, %6 : vector<16x32xf32>
    %8 = arith.truncf %7 : vector<16x32xf32> to vector<16x32xbf16>
    %c0_6 = arith.constant 0 : index
    %c0_7 = arith.constant 0 : index
    %9 = vector.load %arg4[%c0_6, %c0_7] : memref<32x128xbf16, #tpu.memory_space<vmem>>, vector<32x128xbf16>
    %cst_8 = arith.constant dense<0.000000e+00> : vector<16x128xf32>
    %10 = tpu.matmul %8, %9, %cst_8 {dimension_numbers = #tpu.dot_dimension_numbers<[1], [0], [0], [1], [0, 0, 1, 1], [], []>} : vector<16x32xbf16>, vector<32x128xbf16>, vector<16x128xf32> -> vector<16x128xf32>
    %c0_9 = arith.constant 0 : index
    %c0_10 = arith.constant 0 : index
    %11 = vector.load %arg5[%c0_9, %c0_10] : memref<1x128xf32, #tpu.memory_space<vmem>>, vector<1x128xf32>
    %12 = vector.broadcast %11 : vector<1x128xf32> to vector<16x128xf32>
    %13 = arith.addf %10, %12 : vector<16x128xf32>
    %14 = tpu.iota {dimensions = array<i32: 1>} : vector<16x128xi32>
    %c6_i32 = arith.constant 6 : i32
    %15 = vector.broadcast %c6_i32 : i32 to vector<16x128xi32>
    %16 = arith.cmpi slt, %14, %15 : vector<16x128xi32>
    %cst_11 = arith.constant -1.000000e+30 : f32
    %17 = vector.broadcast %cst_11 : f32 to vector<16x128xf32>
    %18 = arith.select %16, %13, %17 : vector<16x128xi1>, vector<16x128xf32>
    %cst_12 = arith.constant dense<0xFF800000> : vector<16xf32>
    %19 = vector.multi_reduction <maximumf>, %18, %cst_12 [1] : vector<16x128xf32> to vector<16xf32>
    %20 = vector.shape_cast %19 : vector<16xf32> to vector<16x1xf32>
    %21 = vector.broadcast %20 : vector<16x1xf32> to vector<16x128xf32>
    %22 = arith.subf %18, %21 : vector<16x128xf32>
    %23 = math.exp %22 : vector<16x128xf32>
    %cst_13 = arith.constant 0.000000e+00 : f32
    %24 = vector.broadcast %cst_13 : f32 to vector<16x128xf32>
    %25 = arith.select %16, %23, %24 : vector<16x128xi1>, vector<16x128xf32>
    %cst_14 = arith.constant dense<0.000000e+00> : vector<16xf32>
    %26 = vector.multi_reduction <add>, %25, %cst_14 [1] : vector<16x128xf32> to vector<16xf32>
    %27 = vector.shape_cast %26 : vector<16xf32> to vector<16x1xf32>
    %28 = vector.broadcast %27 : vector<16x1xf32> to vector<16x128xf32>
    %29 = arith.divf %25, %28 : vector<16x128xf32>
    %30 = arith.select %16, %29, %13 : vector<16x128xi1>, vector<16x128xf32>
    %c0_15 = arith.constant 0 : index
    %c0_16 = arith.constant 0 : index
    %31 = vector.load %arg6[%c0_15, %c0_16] : memref<16x128xf32, #tpu.memory_space<vmem>>, vector<16x128xf32>
    tpu.vector_store %arg6[%c0_15, %c0_16], %30 {strides = array<i32>} : memref<16x128xf32, #tpu.memory_space<vmem>>, vector<16x128xf32>,
    return
  }
  func.func @transform_0(%arg0: i32) -> (i32, i32) {
    %c0_i32 = arith.constant 0 : i32
    %c0_i32_0 = arith.constant 0 : i32
    return %arg0, %c0_i32 : i32, i32
  }
  func.func @transform_1(%arg0: i32) -> (i32, i32) {
    %c0_i32 = arith.constant 0 : i32
    %c0_i32_0 = arith.constant 0 : i32
    %c0_i32_1 = arith.constant 0 : i32
    return %c0_i32, %c0_i32_0 : i32, i32
  }
  func.func @transform_2(%arg0: i32) -> (i32, i32) {
    %c0_i32 = arith.constant 0 : i32
    %c0_i32_0 = arith.constant 0 : i32
    %c0_i32_1 = arith.constant 0 : i32
    return %c0_i32, %c0_i32_0 : i32, i32
  }
  func.func @transform_3(%arg0: i32) -> (i32, i32) {
    %c0_i32 = arith.constant 0 : i32
    %c0_i32_0 = arith.constant 0 : i32
    %c0_i32_1 = arith.constant 0 : i32
    return %c0_i32, %c0_i32_0 : i32, i32
  }
  func.func @transform_4(%arg0: i32) -> (i32, i32) {
    %c0_i32 = arith.constant 0 : i32
    %c0_i32_0 = arith.constant 0 : i32
    %c0_i32_1 = arith.constant 0 : i32
    return %c0_i32, %c0_i32_0 : i32, i32
  }
  func.func @transform_5(%arg0: i32) -> (i32, i32) {
    %c0_i32 = arith.constant 0 : i32
    %c0_i32_0 = arith.constant 0 : i32
    return %arg0, %c0_i32 : i32, i32
  }
}

</mosaic_0001>

<bundles_post_ra>
// kernel: tpu_custom_call.1
= control target key start
LH: loop header
LB: loop body
LE: loop exit
PB: predicated region body
PF: predicated region fallthrough
CT: control target
= control target key end

     0   :  { %s1429_s0 = inlined_call_operand.vmem [shape: bf16[16,1024], index: 0, kind: input, shape index: {}]   ;;  %s1430_s1 = inlined_call_operand.vmem [shape: bf16[1024,32], index: 1, kind: input, shape index: {}]   ;;  %s1431_s2 = inlined_call_operand.vmem [shape: f32[1,32], index: 2, kind: input, shape index: {}]   ;;  %s1432_s3 = inlined_call_operand.vmem [shape: bf16[32,128], index: 3, kind: input, shape index: {}]   ;;  %s1433_s4 = inlined_call_operand.vmem [shape: f32[1,128], index: 4, kind: input, shape index: {}]   ;;  %s1434_s5 = inlined_call_operand.hbm [shape: f32[16,128], index: 5, kind: output, shape index: {}]  }
   0x1   :  { %v1050_v0 = vld [vmem:[%s1430_s1 + $0x40] sm:$0xff]   ;;  %v1054_v4 = vld [vmem:[%s1430_s1 + $0x48] sm:$0xff]   ;;  %v1058_v8 = vld [vmem:[%s1430_s1 + $0x50] sm:$0xff]  }
   0x2   :  { %v1051_v1 = vld [vmem:[%s1430_s1 + $0xc0] sm:$0xff]   ;;  %946 = vmatprep.subr.bf16.mxu0 %v1050_v0  ;;  %v1055_v5 = vld [vmem:[%s1430_s1 + $0xc8] sm:$0xff]   ;;  %v1059_v9 = vld [vmem:[%s1430_s1 + $0xd0] sm:$0xff]  }
   0x3   :  { %v1052_v2 = vld [vmem:[%s1430_s1] sm:$0xff]   ;;  %968 = vmatprep.subr.bf16.mxu1 %v1051_v1  ;;  %v1056_v6 = vld [vmem:[%s1430_s1 + $0x8] sm:$0xff]   ;;  %v1060_v10 = vld [vmem:[%s1430_s1 + $0x10] sm:$0xff]  }
   0x4   :  { %v1053_v3 = vld [vmem:[%s1430_s1 + $0x80] sm:$0xff]   ;;  %947 = vmatpush3.bf16.msra.mxu0 %v1052_v2  ;;  %v1057_v7 = vld [vmem:[%s1430_s1 + $0x88] sm:$0xff]   ;;  %v1061_v11 = vld [vmem:[%s1430_s1 + $0x90] sm:$0xff]  }
   0x5   :  { %969 = vmatpush3.bf16.msra.mxu1 %v1053_v3  ;;  %948 = vmatprep.subr.bf16.mxu0 %v1054_v4  ;;  %v1062_v12 = vld [vmem:[%s1430_s1 + $0x58] sm:$0xff]   ;;  %v1066_v16 = vld [vmem:[%s1430_s1 + $0x60] sm:$0xff]   ;;  %v1070_v20 = vld [vmem:[%s1430_s1 + $0x68] sm:$0xff]  }
   0x6   :  { %970 = vmatprep.subr.bf16.mxu1 %v1055_v5  ;;  %v1063_v13 = vld [vmem:[%s1430_s1 + $0xd8] sm:$0xff]   ;;  %v1067_v17 = vld [vmem:[%s1430_s1 + $0xe0] sm:$0xff]   ;;  %v1071_v21 = vld [vmem:[%s1430_s1 + $0xe8] sm:$0xff]  }
   0x7   :  { %v1064_v14 = vld [vmem:[%s1430_s1 + $0x18] sm:$0xff]   ;;  %v1068_v18 = vld [vmem:[%s1430_s1 + $0x20] sm:$0xff]   ;;  %v1072_v22 = vld [vmem:[%s1430_s1 + $0x28] sm:$0xff]  }
   0x8   :  { %949 = vmatpush3.bf16.msra.mxu0 %v1056_v6  ;;  %v1065_v15 = vld [vmem:[%s1430_s1 + $0x98] sm:$0xff]   ;;  %v1069_v19 = vld [vmem:[%s1430_s1 + $0xa0] sm:$0xff]   ;;  %v1073_v23 = vld [vmem:[%s1430_s1 + $0xa8] sm:$0xff]  }
   0x9   :  { %971 = vmatpush3.bf16.msra.mxu1 %v1057_v7  ;;  %950 = vmatprep.subr.bf16.mxu0 %v1058_v8  ;;  %v1074_v24 = vld [vmem:[%s1430_s1 + $0x70] sm:$0xff]   ;;  %v1078_v28 = vld [vmem:[%s1430_s1 + $0x78] sm:$0xff]   ;;  %v22_v32 = vld [vmem:[%s1429_s0] sm:$0xff] }
   0xa   :  { %972 = vmatprep.subr.bf16.mxu1 %v1059_v9  ;;  %v1075_v25 = vld [vmem:[%s1430_s1 + $0xf0] sm:$0xff]   ;;  %v1079_v29 = vld [vmem:[%s1430_s1 + $0xf8] sm:$0xff]   ;;  %v26_v33 = vld [vmem:[%s1429_s0 + $0x20] sm:$0xff] }
   0xb   :  { %v1076_v26 = vld [vmem:[%s1430_s1 + $0x30] sm:$0xff]   ;;  %v1080_v30 = vld [vmem:[%s1430_s1 + $0x38] sm:$0xff]   ;;  %v23_v34 = vld [vmem:[%s1429_s0 + $0x8] sm:$0xff]  ;;  %v870_v35 = vcombine.low %v22_v32, %v26_v33  ;;  %v871_v36 = vcombine.high %v22_v32, %v26_v33 }
   0xc   :  { %951 = vmatpush3.bf16.msra.mxu0 %v1060_v10  ;;  %v1077_v27 = vld [vmem:[%s1430_s1 + $0xb0] sm:$0xff]   ;;  %v1081_v31 = vld [vmem:[%s1430_s1 + $0xb8] sm:$0xff]   ;;  %v27_v37 = vld [vmem:[%s1429_s0 + $0x28] sm:$0xff] }
   0xd   :  { %973 = vmatpush3.bf16.msra.mxu1 %v1061_v11  ;;  %952 = vmatprep.subr.bf16.mxu0 %v1062_v12  ;;  %v872_v38 = vcombine.low %v23_v34, %v27_v37  ;;  %v873_v39 = vcombine.high %v23_v34, %v27_v37  ;;  %v1082_v40 = vld [vmem:[%s1430_s1 + $0x140] sm:$0xff]   ;;  %v1086_v44 = vld [vmem:[%s1430_s1 + $0x148] sm:$0xff]   ;;  %v1090_v48 = vld [vmem:[%s1430_s1 + $0x150] sm:$0xff]  }
   0xe   :  { %974 = vmatprep.subr.bf16.mxu1 %v1063_v13  ;;  %621 = vmatprep.mubr.bf16.mxu0 %v871_v36  ;;  %v1083_v41 = vld [vmem:[%s1430_s1 + $0x1c0] sm:$0xff]   ;;  %v1087_v45 = vld [vmem:[%s1430_s1 + $0x1c8] sm:$0xff]   ;;  %v1091_v49 = vld [vmem:[%s1430_s1 + $0x1d0] sm:$0xff]  }
   0xf   :  { %662 = vmatprep.mubr.bf16.mxu1 %v873_v39  ;;  %v1084_v42 = vld [vmem:[%s1430_s1 + $0x100] sm:$0xff]   ;;  %v1088_v46 = vld [vmem:[%s1430_s1 + $0x108] sm:$0xff]   ;;  %v1092_v50 = vld [vmem:[%s1430_s1 + $0x110] sm:$0xff]  }
  0x10   :  { %953 = vmatpush3.bf16.msra.mxu0 %v1064_v14  ;;  %v1085_v43 = vld [vmem:[%s1430_s1 + $0x180] sm:$0xff]   ;;  %v1089_v47 = vld [vmem:[%s1430_s1 + $0x188] sm:$0xff]   ;;  %v1093_v51 = vld [vmem:[%s1430_s1 + $0x190] sm:$0xff]  }
  0x11   :  { %975 = vmatpush3.bf16.msra.mxu1 %v1065_v15  ;;  %954 = vmatprep.subr.bf16.mxu0 %v1066_v16  ;;  %v1094_v52 = vld [vmem:[%s1430_s1 + $0x158] sm:$0xff]   ;;  %v1098_v56 = vld [vmem:[%s1430_s1 + $0x160] sm:$0xff]   ;;  %v1102_v60 = vld [vmem:[%s1430_s1 + $0x168] sm:$0xff]  }
  0x12   :  { %976 = vmatprep.subr.bf16.mxu1 %v1067_v17  ;;  %v1095_v53 = vld [vmem:[%s1430_s1 + $0x1d8] sm:$0xff]   ;;  %v1099_v57 = vld [vmem:[%s1430_s1 + $0x1e0] sm:$0xff]   ;;  %v1103_v61 = vld [vmem:[%s1430_s1 + $0x1e8] sm:$0xff]  }
  0x13   :  { %v1096_v54 = vld [vmem:[%s1430_s1 + $0x118] sm:$0xff]   ;;  %v1100_v58 = vld [vmem:[%s1430_s1 + $0x120] sm:$0xff]   ;;  %v1104_v62 = vld [vmem:[%s1430_s1 + $0x128] sm:$0xff]  }
  0x14   :  { %955 = vmatpush3.bf16.msra.mxu0 %v1068_v18  ;;  %v1097_v55 = vld [vmem:[%s1430_s1 + $0x198] sm:$0xff]   ;;  %v1101_v59 = vld [vmem:[%s1430_s1 + $0x1a0] sm:$0xff]   ;;  %v1105_v63 = vld [vmem:[%s1430_s1 + $0x1a8] sm:$0xff]  }
  0x15   :  { %977 = vmatpush3.bf16.msra.mxu1 %v1069_v19  ;;  %956 = vmatprep.subr.bf16.mxu0 %v1070_v20  ;;  %v1106_v0 = vld [vmem:[%s1430_s1 + $0x170] sm:$0xff]   ;;  %v1110_v4 = vld [vmem:[%s1430_s1 + $0x178] sm:$0xff]  }
  0x16   :  { %978 = vmatprep.subr.bf16.mxu1 %v1071_v21  ;;  %v1107_v1 = vld [vmem:[%s1430_s1 + $0x1f0] sm:$0xff]   ;;  %v1111_v5 = vld [vmem:[%s1430_s1 + $0x1f8] sm:$0xff]  }
  0x17   :  { %v1108_v2 = vld [vmem:[%s1430_s1 + $0x130] sm:$0xff]   ;;  %v1112_v6 = vld [vmem:[%s1430_s1 + $0x138] sm:$0xff]  }
  0x18   :  { %957 = vmatpush3.bf16.msra.mxu0 %v1072_v22  ;;  %v1109_v3 = vld [vmem:[%s1430_s1 + $0x1b0] sm:$0xff]   ;;  %v1113_v7 = vld [vmem:[%s1430_s1 + $0x1b8] sm:$0xff]  }
  0x19   :  { %979 = vmatpush3.bf16.msra.mxu1 %v1073_v23  ;;  %958 = vmatprep.subr.bf16.mxu0 %v1074_v24  ;;  %v24_v8 = vld [vmem:[%s1429_s0 + $0x10] sm:$0xff]  ;;  %v25_v12 = vld [vmem:[%s1429_s0 + $0x18] sm:$0xff] }
  0x1a   :  { %980 = vmatprep.subr.bf16.mxu1 %v1075_v25  ;;  %v28_v9 = vld [vmem:[%s1429_s0 + $0x30] sm:$0xff]  ;;  %v29_v13 = vld [vmem:[%s1429_s0 + $0x38] sm:$0xff] }
  0x1b   :  { %v874_v10 = vcombine.low %v24_v8, %v28_v9  ;;  %v875_v11 = vcombine.high %v24_v8, %v28_v9  ;;  %v876_v14 = vcombine.low %v25_v12, %v29_v13  ;;  %v877_v15 = vcombine.high %v25_v12, %v29_v13 }
  0x1c   :  { %959 = vmatpush3.bf16.msra.mxu0 %v1076_v26 }
  0x1d   :  { %981 = vmatpush3.bf16.msra.mxu1 %v1077_v27  ;;  %960 = vmatprep.subr.bf16.mxu0 %v1078_v28 }
  0x1e   :  { %982 = vmatprep.subr.bf16.mxu1 %v1079_v29 }
  0x20   :  { %961 = vmatpush3.bf16.msra.mxu0 %v1080_v30 }
  0x21   :  { %983 = vmatpush3.bf16.msra.mxu1 %v1081_v31  ;;  %990 = vmatprep.subr.bf16.mxu0 %v1082_v40 }
  0x22   :  { %1012 = vmatprep.subr.bf16.mxu1 %v1083_v41 }
  0x23   :  { %622 = vmatmul.mubr.bf16.vlgmr.msra.gmra.mrb[0].mxu0 %v870_v35 }
  0x24   :  { %663 = vmatmul.mubr.bf16.vlgmr.msra.gmra.mrb[0].mxu1 %v872_v38  ;;  %991 = vmatpush3.bf16.msra.mxu0 %v1084_v42 }
  0x25   :  { %1013 = vmatpush3.bf16.msra.mxu1 %v1085_v43  ;;  %992 = vmatprep.subr.bf16.mxu0 %v1086_v44 }
  0x26   :  { %1014 = vmatprep.subr.bf16.mxu1 %v1087_v45  ;;  %703 = vmatprep.mubr.bf16.mxu0 %v875_v11 }
  0x28   :  { %993 = vmatpush3.bf16.msra.mxu0 %v1088_v46 }
  0x29   :  { %1015 = vmatpush3.bf16.msra.mxu1 %v1089_v47  ;;  %994 = vmatprep.subr.bf16.mxu0 %v1090_v48 }
  0x2a   :  { %1016 = vmatprep.subr.bf16.mxu1 %v1091_v49 }
  0x2c   :  { %995 = vmatpush3.bf16.msra.mxu0 %v1092_v50 }
  0x2d   :  { %1017 = vmatpush3.bf16.msra.mxu1 %v1093_v51  ;;  %996 = vmatprep.subr.bf16.mxu0 %v1094_v52 }
  0x2e   :  { %1018 = vmatprep.subr.bf16.mxu1 %v1095_v53 }
  0x30   :  { %997 = vmatpush3.bf16.msra.mxu0 %v1096_v54 }
  0x31   :  { %1019 = vmatpush3.bf16.msra.mxu1 %v1097_v55  ;;  %998 = vmatprep.subr.bf16.mxu0 %v1098_v56 }
  0x32   :  { %1020 = vmatprep.subr.bf16.mxu1 %v1099_v57 }
  0x34   :  { %999 = vmatpush3.bf16.msra.mxu0 %v1100_v58 }
  0x35   :  { %1021 = vmatpush3.bf16.msra.mxu1 %v1101_v59  ;;  %1000 = vmatprep.subr.bf16.mxu0 %v1102_v60 }
  0x36   :  { %1022 = vmatprep.subr.bf16.mxu1 %v1103_v61 }
  0x38   :  { %1001 = vmatpush3.bf16.msra.mxu0 %v1104_v62 }
  0x39   :  { %1023 = vmatpush3.bf16.msra.mxu1 %v1105_v63  ;;  %1002 = vmatprep.subr.bf16.mxu0 %v1106_v0 }
  0x3a   :  { %1024 = vmatprep.subr.bf16.mxu1 %v1107_v1 }
  0x3c   :  { %1003 = vmatpush3.bf16.msra.mxu0 %v1108_v2 }
  0x3d   :  { %1025 = vmatpush3.bf16.msra.mxu1 %v1109_v3  ;;  %1004 = vmatprep.subr.bf16.mxu0 %v1110_v4 }
  0x3e   :  { %1026 = vmatprep.subr.bf16.mxu1 %v1111_v5 }
  0x40   :  { %1005 = vmatpush3.bf16.msra.mxu0 %v1112_v6 }
  0x41   :  { %1027 = vmatpush3.bf16.msra.mxu1 %v1113_v7 }
  0x42   :  { %10 = vsyncpa [#allocation3], 0  ;;  %744 = vmatprep.mubr.bf16.mxu1 %v877_v15  ;;  %v1114_v16 = vld [vmem:[%s1432_s3] sm:$0xff]   ;;  %v1148_v17 = vmov 0.0   ;;  %v1115_v18 = vld [vmem:[%s1432_s3 + $0x8] sm:$0xff]   ;;  %vm1149_vm0 = vmmov 0   ;;  %v824_v55 = vlaneseq }
  0x43   :  { %704 = vmatmul.mubr.bf16.vlgmr.msra.gmra.mrb[4].mxu0 %v874_v10  ;;  %1037 = vmatprep.subr.bf16.mxu0 %v1148_v17  ;;  %v869_v21 = vld [vmem:[%s1431_s2] ss:$0 sm:$0xff]  ;;  %vm779_vm1 = vcmask 261120  }
  0x44   :  { %745 = vmatmul.mubr.bf16.vlgmr.msra.gmra.mrb[4].mxu1 %v876_v14  ;;  %1038 = vmatpush3.bf16.msra.mxu0 %v1114_v16  ;;  %v825_v56 = vand.u32 127, %v824_v55  ;;  %v942_v57 = vld [vmem:[%s1433_s4] ss:$0 sm:$0xff]  ;;  %s1150_s4 = smov [#allocation2]  }
  0x45   :  { %1039 = vmatprep.subr.bf16.mxu0 %v1148_v17  ;;  %1041 = vmatprep.mubr.msk.bf16.mxu0 %vm1149_vm0, %v1148_v17  ;;  %s858_s16 = sshll.u32 %s1150_s4, 4  ;;  %s859_s16 = int_to_ptr.vmem [resolvable:$true] %s858_s16 }
  0x46   :  { %vm826_vm2 = vcmp.lt.s32.totalorder %v825_v56, 6  ;;  %s1124_s17 = scalar_lea.vmem %s859_s16, 256  ;;  %p1129_p1 = scmp.lt.s32.totalorder %s859_s16, %s859_s16 }
  0x47   :  { %p1125_p0 = scmp.ne.s32.totalorder %s859_s16, %s1124_s17  ;;  %p1130_p2 = scmp.lt.s32.totalorder %s1124_s17, %s1124_s17 }
  0x48   :  { %1040 = vmatpush3.bf16.msra.mxu0 %v1115_v18 }
  0x49   :  { %p1131_p3 = por %p1130_p2, %p1129_p1 }
  0x4b   :  { %p1132_p4 = pnand %p1131_p3, %p1125_p0 }
  0xf6   :  { %v962_v19 = vpop.f32.mrb[0].mxu0 }
  0xf7   :  { %v984_v20 = vpop.f32.mrb[0].mxu1  ;;  %v963_v22 = vpop.f32.mrb[1].mxu0 }
  0xf8   :  { %v964_v23 = vadd.f32 %v963_v22, %v962_v19  ;;  %v985_v24 = vpop.f32.mrb[1].mxu1  ;;  %v965_v25 = vpop.f32.mrb[2].mxu0 }
  0xf9   :  { %v986_v26 = vadd.f32 %v985_v24, %v984_v20  ;;  %v987_v27 = vpop.f32.mrb[2].mxu1  ;;  %v966_v28 = vpop.f32.mrb[3].mxu0 }
  0xfa   :  { %v624_v29 = vadd.f32 %v964_v23, %v869_v21  ;;  %v967_v30 = vadd.f32 %v966_v28, %v965_v25  ;;  %v988_v31 = vpop.f32.mrb[3].mxu1 }
  0xfb   :  { %v989_v32 = vadd.f32 %v988_v31, %v987_v27 }
  0xfc   :  { %v665_v33 = vadd.f32 %v986_v26, %v624_v29  ;;  %v627_v34 = vadd.f32 %v967_v30, %v869_v21 }
  0xfe   :  { %v668_v35 = vadd.f32 %v989_v32, %v627_v34 }
 0x116   :  { %v1006_v36 = vpop.f32.mrb[4].mxu0 }
 0x117   :  { %v1028_v37 = vpop.f32.mrb[4].mxu1  ;;  %v1007_v38 = vpop.f32.mrb[5].mxu0 }
 0x118   :  { %v1008_v39 = vadd.f32 %v1007_v38, %v1006_v36  ;;  %v1029_v40 = vpop.f32.mrb[5].mxu1  ;;  %v1009_v41 = vpop.f32.mrb[6].mxu0 }
 0x119   :  { %v1030_v42 = vadd.f32 %v1029_v40, %v1028_v37  ;;  %v1031_v43 = vpop.f32.mrb[6].mxu1  ;;  %v1010_v44 = vpop.f32.mrb[7].mxu0 }
 0x11a   :  { %v706_v45 = vadd.f32 %v1008_v39, %v665_v33  ;;  %v1011_v46 = vadd.f32 %v1010_v44, %v1009_v41  ;;  %v1032_v47 = vpop.f32.mrb[7].mxu1 }
 0x11b   :  { %v1033_v48 = vadd.f32 %v1032_v47, %v1031_v43 }
 0x11c   :  { %v747_v49 = vadd.f32 %v1030_v42, %v706_v45  ;;  %v709_v50 = vadd.f32 %v1011_v46, %v668_v35 }
 0x11e   :  { %v750_v51 = vadd.f32 %v1033_v48, %v709_v50  ;;  %v753_v52 = vmax.f32 %v747_v49, 0.0 }
 0x120   :  { %v754_v53 = vmax.f32 %v750_v51, 0.0 }
 0x122   :  { %v755_v54 = vpack.c.bf16 %v754_v53, %v753_v52 }
 0x124   :  { %1042 = vmatmul.mubr.msk.bf16.vlgmr.msra.gmra.mrb[8].mxu0 %vm779_vm1, %v755_v54 }
 0x1f7   :  { %v817_v58 = vpop.f32.mrb[8].mxu0 }
 0x1f8   :  { %v818_v59 = vadd.f32 %v942_v57, %v817_v58  ;;  %v1043_v60 = vpop.f32.mrb[9].mxu0 }
 0x1f9   :  { %v820_v61 = vpop.f32.mrb[10].mxu0 }
 0x1fa   :  { %v821_v62 = vadd.f32 %v942_v57, %v820_v61  ;;  %v1044_v63 = vpop.f32.mrb[11].mxu0  ;;  %v827_v0 = vsel %vm826_vm2, %v818_v59, -1e+30 }
 0x1fb   :  { %829 = vmax.xlane.f32.xlu0 %v827_v0 }
 0x1fc   :  { %v828_v1 = vsel %vm826_vm2, %v821_v62, -1e+30 }
 0x1ff   :  { %831 = vmax.xlane.f32.xlu0 %v828_v1 }
 0x288   :  { %v830_v2 = vpop.xlane.xlu0 %829 }
 0x289   :  { %v833_v3 = vsub.f32 %v827_v0, %v830_v2 }
 0x28b   :  { %v835_v4 = vmul.f32 1.442695, %v833_v3 }
 0x28c   :  { %v832_v5 = vpop.xlane.xlu0 %831 }
 0x28d   :  { %1116 = vpow2.f32 %v835_v4  ;;  %v834_v6 = vsub.f32 %v828_v1, %v832_v5 }
 0x28f   :  { %v837_v7 = vmul.f32 1.442695, %v834_v6 }
 0x291   :  { %1118 = vpow2.f32 %v837_v7 }
 0x297   :  { %v1117_v8 = vpop.eup %1116 }
 0x298   :  { %v839_v9 = vsel %vm826_vm2, %v1117_v8, 0.0 }
 0x299   :  { %841 = vadd.xlane.f32.xlu1 %v839_v9 }
 0x29b   :  { %v1119_v10 = vpop.eup %1118 }
 0x29c   :  { %v840_v11 = vsel %vm826_vm2, %v1119_v10, 0.0 }
 0x29d   :  { %843 = vadd.xlane.f32.xlu1 %v840_v11 }
 0x326   :  { %v842_v12 = vpop.xlane.xlu1 %841 }
 0x327   :  { %1120 = vrcp.f32 %v842_v12 }
 0x32a   :  { %v844_v13 = vpop.xlane.xlu1 %843 }
 0x32b   :  { %1122 = vrcp.f32 %v844_v13 }
 0x331   :  { %v1121_v14 = vpop.eup %1120 }
 0x332   :  { %v846_v15 = vmul.f32 %v1121_v14, %v839_v9 }
 0x334   :  { %v849_v16 = vsel %vm826_vm2, %v846_v15, %v818_v59 }
 0x335   :  { %v1123_v17 = vpop.eup %1122  ;;  %851 = vst [vmem:[#allocation2] sm:$0xff] %v849_v16 }
 0x336   :  { %v848_v18 = vmul.f32 %v1123_v17, %v840_v11 }
 0x338   :  { %v850_v19 = vsel %vm826_vm2, %v848_v18, %v821_v62 }
 0x339   :  { %852 = vst [vmem:[#allocation2 + $0x8] sm:$0xff] %v850_v19 }
 0x33a   :  { %1135 = shalt.err (!%p1132_p4)
}
 0x33b   :  { %s1136_s20 = scalar_lea.hbm %s1434_s5, 256 }
 0x33c   :  { %p1137_p5 = scmp.ne.s32.totalorder %s1434_s5, %s1136_s20  ;;  %p1140_p6 = scmp.lt.u32.totalorder %s1136_s20, %s1434_s5 }
 0x33e   :  { %p1142_p7 = pnand %p1140_p6, %p1137_p5 }
 0x340   :  { %1145 = shalt.err (!%p1142_p7)
}
 0x341   :  { %s1151_s25 = smov 128   ;;  %s1152_s26 = smov 8  }
 0x342   :  { %864 = dma.vmem_to_hbm [thread:$0]  %s859_s16, 256, %s1434_s5, [#allocation3], %s1151_s25, %s1151_s25, %s1152_s26  }
 0x343   :  { %1146 = dma.done.wait [#allocation3], 256  }
 0x344   :  { %1147 = vsyncadd [#allocation3], 4294967040 }
 0x345   :  { %868 = vsyncpa [#allocation3], 1 }

</bundles_post_ra>
